<compile_context>
chip_gen: v5e
topology: v5e:2x2
jax: 0.10.0
libtpu: 0.0.40
codegen_flags: <defaults>
</compile_context>

<pallas_src>
import functools

import jax
import jax.numpy as jnp
from jax.experimental import pallas as pl
from jax.experimental.pallas import tpu as pltpu

LANE = 128  # lane width; also 4*hidden_dim for this model


def lstm_full_kernel(ids_ref, w_ref, o_ref, hs_sc, *, T, B, H, V_pad, bias_row):
    TB = T * B
    G4 = 4 * H

    # ---- fused embedding + input projection + bias (one MXU matmul) ----
    # one_hot[r, v] = (ids[r] == v) | (v == bias_row); row `bias_row` of the table
    # holds b_ih + b_hh, so the gate bias is folded into the same matmul.
    v_idx = jax.lax.broadcasted_iota(jnp.int32, (TB, V_pad), 1)
    one_hot = ((v_idx == ids_ref[...]) | (v_idx == bias_row)).astype(jnp.float32)
    gates_x = jnp.dot(one_hot, w_ref[0:V_pad, :],
                      preferred_element_type=jnp.float32)          # (TB, 4H)

    whh = w_ref[V_pad:V_pad + H, :]                                 # (H, 4H), load once

    # tanh(x) = 2*sigmoid(2x) - 1; the 2x is pre-folded into the g-gate columns of the
    # weights, so each step is ONE sigmoid over the whole (B,4H) vreg plus a VPU affine
    # fix-up on the g lanes (constants hoisted out of the loop).
    col = jax.lax.broadcasted_iota(jnp.int32, (B, G4), 1)
    g_lane = (col >= 2 * H) & (col < 3 * H)
    scale = jnp.where(g_lane, 2.0, 1.0).astype(jnp.float32)
    shift = jnp.where(g_lane, -1.0, 0.0).astype(jnp.float32)

    h = jnp.zeros((B, H), jnp.float32)
    c = jnp.zeros((B, H), jnp.float32)

    # T is tiny and static -> fully unrolled recurrence, all slices static.
    # TODO(synk): on v7x, keep W_hh stationary in the MXU via pltpu.matmul_push_rhs /
    # matmul_acc_lhs / matmul_pop to cut per-step fill latency on the serial chain.
    for t in range(T):
        gates = gates_x[t * B:(t + 1) * B, :] + jnp.dot(
            h, whh, preferred_element_type=jnp.float32)             # (B, 4H)
        act = scale * jax.nn.sigmoid(gates) + shift
        i_g = act[:, 0 * H:1 * H]
        f_g = act[:, 1 * H:2 * H]
        g_g = act[:, 2 * H:3 * H]
        o_g = act[:, 3 * H:4 * H]
        c = f_g * c + i_g * g_g
        h = o_g * jnp.tanh(c)
        hs_sc[pl.ds(t * B, B), :] = h                               # time-major (T*B, H)

    # ---- single batched dense + sigmoid over all timesteps ----
    # Dense weight/bias are zero-padded to 128 lanes: real logits land in column 0 and
    # the one output store is a full-lane-width (T*B, 128) write.
    wd = w_ref[V_pad + H:V_pad + 2 * H, :]                          # (H, 128)
    bd = w_ref[V_pad + 2 * H:V_pad + 2 * H + 1, :]                  # (1, 128)
    logits = jnp.dot(hs_sc[...], wd, preferred_element_type=jnp.float32) + bd
    o_ref[...] = jax.nn.sigmoid(logits)


@functools.partial(jax.jit, static_argnames=("hidden_dim", "vocab_pad", "bias_row"))
def lstm_classifier_forward(inputs, w_slab, *, hidden_dim, vocab_pad, bias_row):
    """inputs: (batch, seq_len+1) int; column 0 = review lengths (unused), rest = tokens."""
    B, T1 = inputs.shape
    T = T1 - 1
    TB = T * B
    H = hidden_dim

    # time-major flat token ids: index t*B + b  <-  inputs[b, t+1]
    ids = inputs.T[1:, :].astype(jnp.int32).reshape(TB, 1)

    vmem = pl.BlockSpec(memory_space=pltpu.MemorySpace.VMEM)
    out = pl.pallas_call(
        functools.partial(lstm_full_kernel, T=T, B=B, H=H,
                          V_pad=vocab_pad, bias_row=bias_row),
        out_shape=jax.ShapeDtypeStruct((TB, LANE), jnp.float32),
        in_specs=[vmem, vmem],
        out_specs=vmem,
        scratch_shapes=[pltpu.VMEM((TB, H), jnp.float32)],          # hidden states, time-major
    )(ids, w_slab)

    # matches output.view(-1, H) -> dense -> sigmoid -> squeeze(): shape (T*B,) time-major
    return out[:, 0]


def init_raw_params(key, embedding_dim, hidden_dim, vocab_size):
    k = jax.random.split(key, 6)
    s = 1.0 / jnp.sqrt(hidden_dim)
    emb = 0.1 * jax.random.normal(k[0], (vocab_size, embedding_dim), jnp.float32)
    emb = emb.at[0].set(0.0)  # padding_idx=0
    w_ih = jax.random.uniform(k[1], (4 * hidden_dim, embedding_dim), jnp.float32, -s, s)
    w_hh = jax.random.uniform(k[2], (4 * hidden_dim, hidden_dim), jnp.float32, -s, s)
    b_ih = jax.random.uniform(k[3], (4 * hidden_dim,), jnp.float32, -s, s)
    b_hh = jax.random.uniform(k[4], (4 * hidden_dim,), jnp.float32, -s, s)
    w_d = jax.random.uniform(k[5], (1, hidden_dim), jnp.float32, -s, s)
    b_d = jnp.zeros((1,), jnp.float32)
    return dict(emb=emb, w_ih=w_ih, w_hh=w_hh, b_ih=b_ih, b_hh=b_hh, w_d=w_d, b_d=b_d)


def pack_params(raw, hidden_dim, vocab_size):
    """Pack everything the kernel needs into ONE (rows, 128) f32 slab (single DMA).

    Layout (all starting rows are multiples of 8 -> free sublane-aligned views):
      rows [0, V_pad)           token->gate table G = emb @ W_ih^T, bias row b_ih+b_hh
                                at row `vocab_size`; g-gate columns pre-scaled by 2
      rows [V_pad, V_pad+H)     W_hh^T, g-gate columns pre-scaled by 2
      rows [V_pad+H, V_pad+2H)  dense weight, zero-padded to 128 lanes (col 0 real)
      row   V_pad+2H            dense bias, zero-padded to 128 lanes (col 0 real)
    """
    H = hidden_dim
    G4 = 4 * H
    assert G4 == LANE, "packed-slab layout assumes 4*hidden_dim == 128 lanes"
    V_pad = -(-(vocab_size + 1) // LANE) * LANE      # room for the bias row
    bias_row = vocab_size

    g_tab = jnp.zeros((V_pad, G4), jnp.float32)
    g_tab = g_tab.at[:vocab_size].set(raw["emb"] @ raw["w_ih"].T)
    g_tab = g_tab.at[bias_row].set(raw["b_ih"] + raw["b_hh"])
    g_tab = g_tab.at[:, 2 * H:3 * H].multiply(2.0)   # tanh(x) = 2*sigmoid(2x) - 1

    whh2 = raw["w_hh"].T.at[:, 2 * H:3 * H].multiply(2.0)           # (H, 4H)

    wd_pad = jnp.zeros((H, LANE), jnp.float32).at[:, 0].set(raw["w_d"][0])
    bd_pad = jnp.zeros((8, LANE), jnp.float32).at[0, 0].set(raw["b_d"][0])

    rows = V_pad + 2 * H + 8
    w_slab = jnp.zeros((rows, LANE), jnp.float32)
    w_slab = w_slab.at[0:V_pad].set(g_tab)
    w_slab = w_slab.at[V_pad:V_pad + H].set(whh2)
    w_slab = w_slab.at[V_pad + H:V_pad + 2 * H].set(wd_pad)
    w_slab = w_slab.at[V_pad + 2 * H:rows].set(bd_pad)
    return w_slab, V_pad, bias_row


def reference_forward(inputs, raw):
    """Pure-JAX reference mirroring PyTorch nn.LSTM math (for validation)."""
    x = inputs.T
    reviews = x[1:, :].astype(jnp.int32)
    embeds = raw["emb"][reviews]                      # (T, B, E)
    H = raw["w_hh"].shape[1]
    B = embeds.shape[1]

    def step(carry, x_t):
        h, c = carry
        gates = x_t @ raw["w_ih"].T + h @ raw["w_hh"].T + raw["b_ih"] + raw["b_hh"]
        i = jax.nn.sigmoid(gates[:, 0 * H:1 * H])
        f = jax.nn.sigmoid(gates[:, 1 * H:2 * H])
        g = jnp.tanh(gates[:, 2 * H:3 * H])
        o = jax.nn.sigmoid(gates[:, 3 * H:4 * H])
        c = f * c + i * g
        h = o * jnp.tanh(c)
        return (h, c), h

    h0 = jnp.zeros((B, H), jnp.float32)
    _, hs = jax.lax.scan(step, (h0, h0), embeds)      # (T, B, H)
    logits = hs.reshape(-1, H) @ raw["w_d"].T + raw["b_d"]
    return jax.nn.sigmoid(logits).reshape(-1)


if __name__ == "__main__":
    embedding_dim, hidden_dim, vocab_size = 16, 32, 50
    batch, seq_len = 2, 8

    key = jax.random.PRNGKey(0)
    pkey, dkey, lkey = jax.random.split(key, 3)
    raw = init_raw_params(pkey, embedding_dim, hidden_dim, vocab_size)
    w_slab, vocab_pad, bias_row = pack_params(raw, hidden_dim, vocab_size)

    tokens = jax.random.randint(dkey, (batch, seq_len), 0, vocab_size, jnp.int32)
    lengths = jax.random.randint(lkey, (batch, 1), 1, seq_len + 1, jnp.int32)
    inputs = jnp.concatenate([lengths, tokens], axis=1)   # (batch, seq_len+1)

    out = lstm_classifier_forward(inputs, w_slab, hidden_dim=hidden_dim,
                                  vocab_pad=vocab_pad, bias_row=bias_row)
    out = jax.block_until_ready(out)

    ref = reference_forward(inputs, raw)
    assert out.shape == (seq_len * batch,)
    assert jnp.allclose(out, ref, rtol=1e-3, atol=1e-3)

    print("KERNEL_OK")
</pallas_src>

<mosaic_0001>
module attributes {stable_mosaic.version = 11 : i64} {
  func.func @lstm_full_kernel(%arg0: memref<16x1xi32, #tpu.memory_space<vmem>>, %arg1: memref<200x128xf32, #tpu.memory_space<vmem>>, %arg2: memref<16x128xf32, #tpu.memory_space<vmem>>, %arg3: memref<16x32xf32, #tpu.memory_space<vmem>>) attributes {dimension_semantics = [], scalar_prefetch = 0 : i64, scratch_operands = 1 : i64, tpu.core_type = #tpu.core_type<tc>} {
    %0 = tpu.iota {dimensions = array<i32: 1>} : vector<16x128xi32>
    %c0 = arith.constant 0 : index
    %c0_0 = arith.constant 0 : index
    %1 = vector.load %arg0[%c0, %c0_0] : memref<16x1xi32, #tpu.memory_space<vmem>>, vector<16x1xi32>
    %2 = vector.broadcast %1 : vector<16x1xi32> to vector<16x128xi32>
    %3 = arith.cmpi eq, %0, %2 : vector<16x128xi32>
    %c50_i32 = arith.constant 50 : i32
    %4 = vector.broadcast %c50_i32 : i32 to vector<16x128xi32>
    %5 = arith.cmpi eq, %0, %4 : vector<16x128xi32>
    %6 = arith.ori %3, %5 : vector<16x128xi1>
    %7 = arith.extui %6 : vector<16x128xi1> to vector<16x128xi32>
    %8 = arith.sitofp %7 : vector<16x128xi32> to vector<16x128xf32>
    %c0_1 = arith.constant 0 : index
    %c0_2 = arith.constant 0 : index
    %9 = vector.load %arg1[%c0_1, %c0_2] : memref<200x128xf32, #tpu.memory_space<vmem>>, vector<128x128xf32>
    %cst = arith.constant dense<0.000000e+00> : vector<16x128xf32>
    %10 = tpu.matmul %8, %9, %cst {dimension_numbers = #tpu.dot_dimension_numbers<[1], [0], [0], [1], [0, 0, 1, 1], [], []>} : vector<16x128xf32>, vector<128x128xf32>, vector<16x128xf32> -> vector<16x128xf32>
    %c128 = arith.constant 128 : index
    %c0_3 = arith.constant 0 : index
    %11 = vector.load %arg1[%c128, %c0_3] : memref<200x128xf32, #tpu.memory_space<vmem>>, vector<32x128xf32>
    %12 = tpu.iota {dimensions = array<i32: 1>} : vector<2x128xi32>
    %c64_i32 = arith.constant 64 : i32
    %13 = vector.broadcast %c64_i32 : i32 to vector<2x128xi32>
    %14 = arith.cmpi sge, %12, %13 : vector<2x128xi32>
    %c96_i32 = arith.constant 96 : i32
    %15 = vector.broadcast %c96_i32 : i32 to vector<2x128xi32>
    %16 = arith.cmpi slt, %12, %15 : vector<2x128xi32>
    %17 = arith.andi %14, %16 : vector<2x128xi1>
    %cst_4 = arith.constant 2.000000e+00 : f32
    %cst_5 = arith.constant 1.000000e+00 : f32
    %18 = vector.broadcast %cst_4 : f32 to vector<2x128xf32>
    %19 = vector.broadcast %cst_5 : f32 to vector<2x128xf32>
    %20 = arith.select %17, %18, %19 : vector<2x128xi1>, vector<2x128xf32>
    %cst_6 = arith.constant -1.000000e+00 : f32
    %cst_7 = arith.constant 0.000000e+00 : f32
    %21 = vector.broadcast %cst_6 : f32 to vector<2x128xf32>
    %22 = vector.broadcast %cst_7 : f32 to vector<2x128xf32>
    %23 = arith.select %17, %21, %22 : vector<2x128xi1>, vector<2x128xf32>
    %cst_8 = arith.constant 0.000000e+00 : f32
    %24 = vector.broadcast %cst_8 : f32 to vector<2x32xf32>
    %cst_9 = arith.constant 0.000000e+00 : f32
    %25 = vector.broadcast %cst_9 : f32 to vector<2x32xf32>
    %26 = vector.extract_strided_slice %10 {offsets = [0, 0], sizes = [2, 128], strides = [1, 1]} : vector<16x128xf32> to vector<2x128xf32>
    %cst_10 = arith.constant dense<0.000000e+00> : vector<2x128xf32>
    %27 = tpu.matmul %24, %11, %cst_10 {dimension_numbers = #tpu.dot_dimension_numbers<[1], [0], [0], [1], [0, 0, 1, 1], [], []>} : vector<2x32xf32>, vector<32x128xf32>, vector<2x128xf32> -> vector<2x128xf32>
    %28 = arith.addf %26, %27 : vector<2x128xf32>
    %29 = arith.negf %28 : vector<2x128xf32>
    %30 = math.exp %29 : vector<2x128xf32>
    %cst_11 = arith.constant 1.000000e+00 : f32
    %31 = vector.broadcast %cst_11 : f32 to vector<2x128xf32>
    %32 = arith.addf %31, %30 : vector<2x128xf32>
    %33 = arith.divf %31, %32 : vector<2x128xf32>
    %34 = arith.mulf %20, %33 : vector<2x128xf32>
    %35 = arith.addf %34, %23 : vector<2x128xf32>
    %36 = vector.extract_strided_slice %35 {offsets = [0, 0], sizes = [2, 32], strides = [1, 1]} : vector<2x128xf32> to vector<2x32xf32>
    %37 = vector.extract_strided_slice %35 {offsets = [0, 32], sizes = [2, 32], strides = [1, 1]} : vector<2x128xf32> to vector<2x32xf32>
    %38 = vector.extract_strided_slice %35 {offsets = [0, 64], sizes = [2, 32], strides = [1, 1]} : vector<2x128xf32> to vector<2x32xf32>
    %39 = vector.extract_strided_slice %35 {offsets = [0, 96], sizes = [2, 32], strides = [1, 1]} : vector<2x128xf32> to vector<2x32xf32>
    %40 = arith.mulf %37, %25 : vector<2x32xf32>
    %41 = arith.mulf %36, %38 : vector<2x32xf32>
    %42 = arith.addf %40, %41 : vector<2x32xf32>
    %43 = math.tanh %42 : vector<2x32xf32>
    %44 = arith.mulf %39, %43 : vector<2x32xf32>
    %c0_12 = arith.constant 0 : index
    %c0_13 = arith.constant 0 : index
    %45 = vector.load %arg3[%c0_12, %c0_13] : memref<16x32xf32, #tpu.memory_space<vmem>>, vector<2x32xf32>
    tpu.vector_store %arg3[%c0_12, %c0_13], %44 {strides = array<i32>} : memref<16x32xf32, #tpu.memory_space<vmem>>, vector<2x32xf32>,
    %46 = vector.extract_strided_slice %10 {offsets = [2, 0], sizes = [2, 128], strides = [1, 1]} : vector<16x128xf32> to vector<2x128xf32>
    %cst_14 = arith.constant dense<0.000000e+00> : vector<2x128xf32>
    %47 = tpu.matmul %44, %11, %cst_14 {dimension_numbers = #tpu.dot_dimension_numbers<[1], [0], [0], [1], [0, 0, 1, 1], [], []>} : vector<2x32xf32>, vector<32x128xf32>, vector<2x128xf32> -> vector<2x128xf32>
    %48 = arith.addf %46, %47 : vector<2x128xf32>
    %49 = arith.negf %48 : vector<2x128xf32>
    %50 = math.exp %49 : vector<2x128xf32>
    %cst_15 = arith.constant 1.000000e+00 : f32
    %51 = vector.broadcast %cst_15 : f32 to vector<2x128xf32>
    %52 = arith.addf %51, %50 : vector<2x128xf32>
    %53 = arith.divf %51, %52 : vector<2x128xf32>
    %54 = arith.mulf %20, %53 : vector<2x128xf32>
    %55 = arith.addf %54, %23 : vector<2x128xf32>
    %56 = vector.extract_strided_slice %55 {offsets = [0, 0], sizes = [2, 32], strides = [1, 1]} : vector<2x128xf32> to vector<2x32xf32>
    %57 = vector.extract_strided_slice %55 {offsets = [0, 32], sizes = [2, 32], strides = [1, 1]} : vector<2x128xf32> to vector<2x32xf32>
    %58 = vector.extract_strided_slice %55 {offsets = [0, 64], sizes = [2, 32], strides = [1, 1]} : vector<2x128xf32> to vector<2x32xf32>
    %59 = vector.extract_strided_slice %55 {offsets = [0, 96], sizes = [2, 32], strides = [1, 1]} : vector<2x128xf32> to vector<2x32xf32>
    %60 = arith.mulf %57, %42 : vector<2x32xf32>
    %61 = arith.mulf %56, %58 : vector<2x32xf32>
    %62 = arith.addf %60, %61 : vector<2x32xf32>
    %63 = math.tanh %62 : vector<2x32xf32>
    %64 = arith.mulf %59, %63 : vector<2x32xf32>
    %c2 = arith.constant 2 : index
    %c0_16 = arith.constant 0 : index
    %65 = vector.load %arg3[%c2, %c0_16] : memref<16x32xf32, #tpu.memory_space<vmem>>, vector<2x32xf32>
    tpu.vector_store %arg3[%c2, %c0_16], %64 {strides = array<i32>} : memref<16x32xf32, #tpu.memory_space<vmem>>, vector<2x32xf32>,
    %66 = vector.extract_strided_slice %10 {offsets = [4, 0], sizes = [2, 128], strides = [1, 1]} : vector<16x128xf32> to vector<2x128xf32>
    %cst_17 = arith.constant dense<0.000000e+00> : vector<2x128xf32>
    %67 = tpu.matmul %64, %11, %cst_17 {dimension_numbers = #tpu.dot_dimension_numbers<[1], [0], [0], [1], [0, 0, 1, 1], [], []>} : vector<2x32xf32>, vector<32x128xf32>, vector<2x128xf32> -> vector<2x128xf32>
    %68 = arith.addf %66, %67 : vector<2x128xf32>
    %69 = arith.negf %68 : vector<2x128xf32>
    %70 = math.exp %69 : vector<2x128xf32>
    %cst_18 = arith.constant 1.000000e+00 : f32
    %71 = vector.broadcast %cst_18 : f32 to vector<2x128xf32>
    %72 = arith.addf %71, %70 : vector<2x128xf32>
    %73 = arith.divf %71, %72 : vector<2x128xf32>
    %74 = arith.mulf %20, %73 : vector<2x128xf32>
    %75 = arith.addf %74, %23 : vector<2x128xf32>
    %76 = vector.extract_strided_slice %75 {offsets = [0, 0], sizes = [2, 32], strides = [1, 1]} : vector<2x128xf32> to vector<2x32xf32>
    %77 = vector.extract_strided_slice %75 {offsets = [0, 32], sizes = [2, 32], strides = [1, 1]} : vector<2x128xf32> to vector<2x32xf32>
    %78 = vector.extract_strided_slice %75 {offsets = [0, 64], sizes = [2, 32], strides = [1, 1]} : vector<2x128xf32> to vector<2x32xf32>
    %79 = vector.extract_strided_slice %75 {offsets = [0, 96], sizes = [2, 32], strides = [1, 1]} : vector<2x128xf32> to vector<2x32xf32>
    %80 = arith.mulf %77, %62 : vector<2x32xf32>
    %81 = arith.mulf %76, %78 : vector<2x32xf32>
    %82 = arith.addf %80, %81 : vector<2x32xf32>
    %83 = math.tanh %82 : vector<2x32xf32>
    %84 = arith.mulf %79, %83 : vector<2x32xf32>
    %c4 = arith.constant 4 : index
    %c0_19 = arith.constant 0 : index
    %85 = vector.load %arg3[%c4, %c0_19] : memref<16x32xf32, #tpu.memory_space<vmem>>, vector<2x32xf32>
    tpu.vector_store %arg3[%c4, %c0_19], %84 {strides = array<i32>} : memref<16x32xf32, #tpu.memory_space<vmem>>, vector<2x32xf32>,
    %86 = vector.extract_strided_slice %10 {offsets = [6, 0], sizes = [2, 128], strides = [1, 1]} : vector<16x128xf32> to vector<2x128xf32>
    %cst_20 = arith.constant dense<0.000000e+00> : vector<2x128xf32>
    %87 = tpu.matmul %84, %11, %cst_20 {dimension_numbers = #tpu.dot_dimension_numbers<[1], [0], [0], [1], [0, 0, 1, 1], [], []>} : vector<2x32xf32>, vector<32x128xf32>, vector<2x128xf32> -> vector<2x128xf32>
    %88 = arith.addf %86, %87 : vector<2x128xf32>
    %89 = arith.negf %88 : vector<2x128xf32>
    %90 = math.exp %89 : vector<2x128xf32>
    %cst_21 = arith.constant 1.000000e+00 : f32
    %91 = vector.broadcast %cst_21 : f32 to vector<2x128xf32>
    %92 = arith.addf %91, %90 : vector<2x128xf32>
    %93 = arith.divf %91, %92 : vector<2x128xf32>
    %94 = arith.mulf %20, %93 : vector<2x128xf32>
    %95 = arith.addf %94, %23 : vector<2x128xf32>
    %96 = vector.extract_strided_slice %95 {offsets = [0, 0], sizes = [2, 32], strides = [1, 1]} : vector<2x128xf32> to vector<2x32xf32>
    %97 = vector.extract_strided_slice %95 {offsets = [0, 32], sizes = [2, 32], strides = [1, 1]} : vector<2x128xf32> to vector<2x32xf32>
    %98 = vector.extract_strided_slice %95 {offsets = [0, 64], sizes = [2, 32], strides = [1, 1]} : vector<2x128xf32> to vector<2x32xf32>
    %99 = vector.extract_strided_slice %95 {offsets = [0, 96], sizes = [2, 32], strides = [1, 1]} : vector<2x128xf32> to vector<2x32xf32>
    %100 = arith.mulf %97, %82 : vector<2x32xf32>
    %101 = arith.mulf %96, %98 : vector<2x32xf32>
    %102 = arith.addf %100, %101 : vector<2x32xf32>
    %103 = math.tanh %102 : vector<2x32xf32>
    %104 = arith.mulf %99, %103 : vector<2x32xf32>
    %c6 = arith.constant 6 : index
    %c0_22 = arith.constant 0 : index
    %105 = vector.load %arg3[%c6, %c0_22] : memref<16x32xf32, #tpu.memory_space<vmem>>, vector<2x32xf32>
    tpu.vector_store %arg3[%c6, %c0_22], %104 {strides = array<i32>} : memref<16x32xf32, #tpu.memory_space<vmem>>, vector<2x32xf32>,
    %106 = vector.extract_strided_slice %10 {offsets = [8, 0], sizes = [2, 128], strides = [1, 1]} : vector<16x128xf32> to vector<2x128xf32>
    %cst_23 = arith.constant dense<0.000000e+00> : vector<2x128xf32>
    %107 = tpu.matmul %104, %11, %cst_23 {dimension_numbers = #tpu.dot_dimension_numbers<[1], [0], [0], [1], [0, 0, 1, 1], [], []>} : vector<2x32xf32>, vector<32x128xf32>, vector<2x128xf32> -> vector<2x128xf32>
    %108 = arith.addf %106, %107 : vector<2x128xf32>
    %109 = arith.negf %108 : vector<2x128xf32>
    %110 = math.exp %109 : vector<2x128xf32>
    %cst_24 = arith.constant 1.000000e+00 : f32
    %111 = vector.broadcast %cst_24 : f32 to vector<2x128xf32>
    %112 = arith.addf %111, %110 : vector<2x128xf32>
    %113 = arith.divf %111, %112 : vector<2x128xf32>
    %114 = arith.mulf %20, %113 : vector<2x128xf32>
    %115 = arith.addf %114, %23 : vector<2x128xf32>
    %116 = vector.extract_strided_slice %115 {offsets = [0, 0], sizes = [2, 32], strides = [1, 1]} : vector<2x128xf32> to vector<2x32xf32>
    %117 = vector.extract_strided_slice %115 {offsets = [0, 32], sizes = [2, 32], strides = [1, 1]} : vector<2x128xf32> to vector<2x32xf32>
    %118 = vector.extract_strided_slice %115 {offsets = [0, 64], sizes = [2, 32], strides = [1, 1]} : vector<2x128xf32> to vector<2x32xf32>
    %119 = vector.extract_strided_slice %115 {offsets = [0, 96], sizes = [2, 32], strides = [1, 1]} : vector<2x128xf32> to vector<2x32xf32>
    %120 = arith.mulf %117, %102 : vector<2x32xf32>
    %121 = arith.mulf %116, %118 : vector<2x32xf32>
    %122 = arith.addf %120, %121 : vector<2x32xf32>
    %123 = math.tanh %122 : vector<2x32xf32>
    %124 = arith.mulf %119, %123 : vector<2x32xf32>
    %c8 = arith.constant 8 : index
    %c0_25 = arith.constant 0 : index
    %125 = vector.load %arg3[%c8, %c0_25] : memref<16x32xf32, #tpu.memory_space<vmem>>, vector<2x32xf32>
    tpu.vector_store %arg3[%c8, %c0_25], %124 {strides = array<i32>} : memref<16x32xf32, #tpu.memory_space<vmem>>, vector<2x32xf32>,
    %126 = vector.extract_strided_slice %10 {offsets = [10, 0], sizes = [2, 128], strides = [1, 1]} : vector<16x128xf32> to vector<2x128xf32>
    %cst_26 = arith.constant dense<0.000000e+00> : vector<2x128xf32>
    %127 = tpu.matmul %124, %11, %cst_26 {dimension_numbers = #tpu.dot_dimension_numbers<[1], [0], [0], [1], [0, 0, 1, 1], [], []>} : vector<2x32xf32>, vector<32x128xf32>, vector<2x128xf32> -> vector<2x128xf32>
    %128 = arith.addf %126, %127 : vector<2x128xf32>
    %129 = arith.negf %128 : vector<2x128xf32>
    %130 = math.exp %129 : vector<2x128xf32>
    %cst_27 = arith.constant 1.000000e+00 : f32
    %131 = vector.broadcast %cst_27 : f32 to vector<2x128xf32>
    %132 = arith.addf %131, %130 : vector<2x128xf32>
    %133 = arith.divf %131, %132 : vector<2x128xf32>
    %134 = arith.mulf %20, %133 : vector<2x128xf32>
    %135 = arith.addf %134, %23 : vector<2x128xf32>
    %136 = vector.extract_strided_slice %135 {offsets = [0, 0], sizes = [2, 32], strides = [1, 1]} : vector<2x128xf32> to vector<2x32xf32>
    %137 = vector.extract_strided_slice %135 {offsets = [0, 32], sizes = [2, 32], strides = [1, 1]} : vector<2x128xf32> to vector<2x32xf32>
    %138 = vector.extract_strided_slice %135 {offsets = [0, 64], sizes = [2, 32], strides = [1, 1]} : vector<2x128xf32> to vector<2x32xf32>
    %139 = vector.extract_strided_slice %135 {offsets = [0, 96], sizes = [2, 32], strides = [1, 1]} : vector<2x128xf32> to vector<2x32xf32>
    %140 = arith.mulf %137, %122 : vector<2x32xf32>
    %141 = arith.mulf %136, %138 : vector<2x32xf32>
    %142 = arith.addf %140, %141 : vector<2x32xf32>
    %143 = math.tanh %142 : vector<2x32xf32>
    %144 = arith.mulf %139, %143 : vector<2x32xf32>
    %c10 = arith.constant 10 : index
    %c0_28 = arith.constant 0 : index
    %145 = vector.load %arg3[%c10, %c0_28] : memref<16x32xf32, #tpu.memory_space<vmem>>, vector<2x32xf32>
    tpu.vector_store %arg3[%c10, %c0_28], %144 {strides = array<i32>} : memref<16x32xf32, #tpu.memory_space<vmem>>, vector<2x32xf32>,
    %146 = vector.extract_strided_slice %10 {offsets = [12, 0], sizes = [2, 128], strides = [1, 1]} : vector<16x128xf32> to vector<2x128xf32>
    %cst_29 = arith.constant dense<0.000000e+00> : vector<2x128xf32>
    %147 = tpu.matmul %144, %11, %cst_29 {dimension_numbers = #tpu.dot_dimension_numbers<[1], [0], [0], [1], [0, 0, 1, 1], [], []>} : vector<2x32xf32>, vector<32x128xf32>, vector<2x128xf32> -> vector<2x128xf32>
    %148 = arith.addf %146, %147 : vector<2x128xf32>
    %149 = arith.negf %148 : vector<2x128xf32>
    %150 = math.exp %149 : vector<2x128xf32>
    %cst_30 = arith.constant 1.000000e+00 : f32
    %151 = vector.broadcast %cst_30 : f32 to vector<2x128xf32>
    %152 = arith.addf %151, %150 : vector<2x128xf32>
    %153 = arith.divf %151, %152 : vector<2x128xf32>
    %154 = arith.mulf %20, %153 : vector<2x128xf32>
    %155 = arith.addf %154, %23 : vector<2x128xf32>
    %156 = vector.extract_strided_slice %155 {offsets = [0, 0], sizes = [2, 32], strides = [1, 1]} : vector<2x128xf32> to vector<2x32xf32>
    %157 = vector.extract_strided_slice %155 {offsets = [0, 32], sizes = [2, 32], strides = [1, 1]} : vector<2x128xf32> to vector<2x32xf32>
    %158 = vector.extract_strided_slice %155 {offsets = [0, 64], sizes = [2, 32], strides = [1, 1]} : vector<2x128xf32> to vector<2x32xf32>
    %159 = vector.extract_strided_slice %155 {offsets = [0, 96], sizes = [2, 32], strides = [1, 1]} : vector<2x128xf32> to vector<2x32xf32>
    %160 = arith.mulf %157, %142 : vector<2x32xf32>
    %161 = arith.mulf %156, %158 : vector<2x32xf32>
    %162 = arith.addf %160, %161 : vector<2x32xf32>
    %163 = math.tanh %162 : vector<2x32xf32>
    %164 = arith.mulf %159, %163 : vector<2x32xf32>
    %c12 = arith.constant 12 : index
    %c0_31 = arith.constant 0 : index
    %165 = vector.load %arg3[%c12, %c0_31] : memref<16x32xf32, #tpu.memory_space<vmem>>, vector<2x32xf32>
    tpu.vector_store %arg3[%c12, %c0_31], %164 {strides = array<i32>} : memref<16x32xf32, #tpu.memory_space<vmem>>, vector<2x32xf32>,
    %166 = vector.extract_strided_slice %10 {offsets = [14, 0], sizes = [2, 128], strides = [1, 1]} : vector<16x128xf32> to vector<2x128xf32>
    %cst_32 = arith.constant dense<0.000000e+00> : vector<2x128xf32>
    %167 = tpu.matmul %164, %11, %cst_32 {dimension_numbers = #tpu.dot_dimension_numbers<[1], [0], [0], [1], [0, 0, 1, 1], [], []>} : vector<2x32xf32>, vector<32x128xf32>, vector<2x128xf32> -> vector<2x128xf32>
    %168 = arith.addf %166, %167 : vector<2x128xf32>
    %169 = arith.negf %168 : vector<2x128xf32>
    %170 = math.exp %169 : vector<2x128xf32>
    %cst_33 = arith.constant 1.000000e+00 : f32
    %171 = vector.broadcast %cst_33 : f32 to vector<2x128xf32>
    %172 = arith.addf %171, %170 : vector<2x128xf32>
    %173 = arith.divf %171, %172 : vector<2x128xf32>
    %174 = arith.mulf %20, %173 : vector<2x128xf32>
    %175 = arith.addf %174, %23 : vector<2x128xf32>
    %176 = vector.extract_strided_slice %175 {offsets = [0, 0], sizes = [2, 32], strides = [1, 1]} : vector<2x128xf32> to vector<2x32xf32>
    %177 = vector.extract_strided_slice %175 {offsets = [0, 32], sizes = [2, 32], strides = [1, 1]} : vector<2x128xf32> to vector<2x32xf32>
    %178 = vector.extract_strided_slice %175 {offsets = [0, 64], sizes = [2, 32], strides = [1, 1]} : vector<2x128xf32> to vector<2x32xf32>
    %179 = vector.extract_strided_slice %175 {offsets = [0, 96], sizes = [2, 32], strides = [1, 1]} : vector<2x128xf32> to vector<2x32xf32>
    %180 = arith.mulf %177, %162 : vector<2x32xf32>
    %181 = arith.mulf %176, %178 : vector<2x32xf32>
    %182 = arith.addf %180, %181 : vector<2x32xf32>
    %183 = math.tanh %182 : vector<2x32xf32>
    %184 = arith.mulf %179, %183 : vector<2x32xf32>
    %c14 = arith.constant 14 : index
    %c0_34 = arith.constant 0 : index
    %185 = vector.load %arg3[%c14, %c0_34] : memref<16x32xf32, #tpu.memory_space<vmem>>, vector<2x32xf32>
    tpu.vector_store %arg3[%c14, %c0_34], %184 {strides = array<i32>} : memref<16x32xf32, #tpu.memory_space<vmem>>, vector<2x32xf32>,
    %c160 = arith.constant 160 : index
    %c0_35 = arith.constant 0 : index
    %186 = vector.load %arg1[%c160, %c0_35] : memref<200x128xf32, #tpu.memory_space<vmem>>, vector<32x128xf32>
    %c192 = arith.constant 192 : index
    %c0_36 = arith.constant 0 : index
    %187 = vector.load %arg1[%c192, %c0_36] : memref<200x128xf32, #tpu.memory_space<vmem>>, vector<1x128xf32>
    %c0_37 = arith.constant 0 : index
    %c0_38 = arith.constant 0 : index
    %188 = vector.load %arg3[%c0_37, %c0_38] : memref<16x32xf32, #tpu.memory_space<vmem>>, vector<16x32xf32>
    %cst_39 = arith.constant dense<0.000000e+00> : vector<16x128xf32>
    %189 = tpu.matmul %188, %186, %cst_39 {dimension_numbers = #tpu.dot_dimension_numbers<[1], [0], [0], [1], [0, 0, 1, 1], [], []>} : vector<16x32xf32>, vector<32x128xf32>, vector<16x128xf32> -> vector<16x128xf32>
    %190 = vector.broadcast %187 : vector<1x128xf32> to vector<16x128xf32>
    %191 = arith.addf %189, %190 : vector<16x128xf32>
    %192 = arith.negf %191 : vector<16x128xf32>
    %193 = math.exp %192 : vector<16x128xf32>
    %cst_40 = arith.constant 1.000000e+00 : f32
    %194 = vector.broadcast %cst_40 : f32 to vector<16x128xf32>
    %195 = arith.addf %194, %193 : vector<16x128xf32>
    %196 = arith.divf %194, %195 : vector<16x128xf32>
    %c0_41 = arith.constant 0 : index
    %c0_42 = arith.constant 0 : index
    %197 = vector.load %arg2[%c0_41, %c0_42] : memref<16x128xf32, #tpu.memory_space<vmem>>, vector<16x128xf32>
    tpu.vector_store %arg2[%c0_41, %c0_42], %196 {strides = array<i32>} : memref<16x128xf32, #tpu.memory_space<vmem>>, vector<16x128xf32>,
    return
  }
}

</mosaic_0001>

<bundles_post_ra>
// kernel: lstm_classifier_forward.1
= control target key start
LH: loop header
LB: loop body
LE: loop exit
PB: predicated region body
PF: predicated region fallthrough
CT: control target
= control target key end

     0   :  { %7 = vsyncpa [#allocation4], 0  ;;  %s880_s12 = smov [#allocation3]   ;;  %s881_s14 = smov 128   ;;  %s1068_s0 = inlined_call_operand.vmem [shape: s32[16,1], index: 0, kind: input, shape index: {}]   ;;  %s1069_s1 = inlined_call_operand.hbm [shape: f32[200,128], index: 1, kind: input, shape index: {}]   ;;  %s1070_s2 = inlined_call_operand.vmem [shape: f32[16,128], index: 2, kind: output, shape index: {}]  }
   0x1   :  { %s14_s11 = sshll.u32 %s1069_s1, 4  ;;  %s16_s13 = sshll.u32 %s880_s12, 4  ;;  %s15_s11 = int_to_ptr.hbm [resolvable:$true] %s14_s11  ;;  %s17_s13 = int_to_ptr.vmem [resolvable:$true] %s16_s13 }
   0x2   :  { %s882_s15 = smov 8  }
   0x3   :  { %22 = dma.hbm_to_vmem [thread:$0]  %s15_s11, 3200, %s17_s13, [#allocation4], %s881_s14, %s881_s14, %s882_s15  }
   0x4   :  { %878 = dma.done.wait [#allocation4], 3200  }
   0x5   :  { %879 = vsyncadd [#allocation4], 4294964096  ;;  %v883_v0 = vmov 0   ;;  %v29_v1 = vld [vmem:[%s1068_s0] sm:$0xff]  ;;  %v61_v2 = vld [vmem:[#allocation3 + $0x78] sm:$0xff]  ;;  %v884_v22 = vmov 0.0   ;;  %v27_v23 = vlaneseq }
   0x6   :  { %795 = vset.pattern.permute.xlu0 %v883_v0  ;;  %796 = vset.pattern.permute.xlu2 %v883_v0  ;;  %v60_v3 = vld [vmem:[#allocation3 + $0x70] sm:$0xff]  ;;  %v59_v4 = vld [vmem:[#allocation3 + $0x68] sm:$0xff]  ;;  %v58_v5 = vld [vmem:[#allocation3 + $0x60] sm:$0xff]  ;;  %v885_v26 = vmov 1.0   ;;  %s886_s1 = smov 64   ;;  %s887_s18 = smov 32  }
   0x7   :  { %32 = vperm.xlu0 %795, %v29_v1   ;;  %62 = vmatpush.msra.mxu0 %v61_v2  ;;  %v909_v6 = vld [vmem:[#allocation3 + $0x98] sm:$0xff]  ;;  %v912_v7 = vld [vmem:[#allocation3 + $0x90] sm:$0xff]  ;;  %v914_v9 = vld [vmem:[#allocation3 + $0x88] sm:$0xff]  ;;  %v945_v24 = vand.u32 127, %v27_v23  ;;  %vm161_vm10 = vcmask 254976   ;;  %vm94_vm11 = vcmask 261120  }
   0x8   :  { %110 = vmatpush.msra.mxu1 %v909_v6  ;;  %v57_v8 = vld [vmem:[#allocation3 + $0x58] sm:$0xff]  ;;  %177 = vmatpush.msra.mxu2 %v909_v6  ;;  %v56_v10 = vld [vmem:[#allocation3 + $0x50] sm:$0xff]  ;;  %v55_v11 = vld [vmem:[#allocation3 + $0x48] sm:$0xff] }
   0x9   :  { %63 = vmatpush.msra.mxu0 %v60_v3  ;;  %253 = vmatpush.msra.mxu3 %v909_v6  ;;  %v54_v12 = vld [vmem:[#allocation3 + $0x40] sm:$0xff]  ;;  %v53_v13 = vld [vmem:[#allocation3 + $0x38] sm:$0xff]  ;;  %v52_v14 = vld [vmem:[#allocation3 + $0x30] sm:$0xff]  ;;  %vm39_vm0 = vcmp.eq.s32.totalorder %v945_v24, 50  ;;  %vm89_vm3 = vcmp.ge.s32.totalorder %v945_v24, 64  ;;  %vm90_vm4 = vcmp.lt.s32.totalorder %v945_v24, 96 }
   0xa   :  { %111 = vmatpush.msra.mxu1 %v912_v7  ;;  %178 = vmatpush.msra.mxu2 %v912_v7  ;;  %v51_v15 = vld [vmem:[#allocation3 + $0x28] sm:$0xff]  ;;  %v50_v16 = vld [vmem:[#allocation3 + $0x20] sm:$0xff]  ;;  %v49_v17 = vld [vmem:[#allocation3 + $0x18] sm:$0xff] }
   0xb   :  { %64 = vmatpush.msra.mxu0 %v59_v4  ;;  %254 = vmatpush.msra.mxu3 %v912_v7  ;;  %v48_v18 = vld [vmem:[#allocation3 + $0x10] sm:$0xff]  ;;  %v47_v19 = vld [vmem:[#allocation3 + $0x8] sm:$0xff]  ;;  %v46_v20 = vld [vmem:[#allocation3] sm:$0xff] }
   0xc   :  { %112 = vmatpush.msra.mxu1 %v914_v9  ;;  %179 = vmatpush.msra.mxu2 %v914_v9  ;;  %v924_v21 = vld [vmem:[#allocation3 + $0x80] sm:$0xff]  ;;  %vm91_vm5 = vmand %vm89_vm3, %vm90_vm4 }
   0xd   :  { %65 = vmatpush.msra.mxu0 %v58_v5  ;;  %255 = vmatpush.msra.mxu3 %v914_v9  ;;  %v958_v40 = vsel %vm91_vm5, 2.0, %v885_v26  ;;  %v960_v43 = vsel %vm91_vm5, -1.0, %v884_v22 }
   0xe   :  { %113 = vmatpush.msra.mxu1 %v924_v21  ;;  %180 = vmatpush.msra.mxu2 %v924_v21 }
   0xf   :  { %66 = vmatpush.msra.mxu0 %v57_v8  ;;  %114 = vmatmul.f32.vlgmr.msra.gmra.mxu1 %v884_v22 }
  0x10   :  { %256 = vmatpush.msra.mxu3 %v924_v21  ;;  %329 = vmatpush.msrb.mxu1 %v909_v6 }
  0x11   :  { %67 = vmatpush.msra.mxu0 %v56_v10  ;;  %405 = vmatpush.msrb.mxu2 %v909_v6 }
  0x12   :  { %474 = vmatpush.msrb.mxu3 %v909_v6  ;;  %330 = vmatpush.msrb.mxu1 %v912_v7 }
  0x13   :  { %68 = vmatpush.msra.mxu0 %v55_v11  ;;  %406 = vmatpush.msrb.mxu2 %v912_v7 }
  0x14   :  { %475 = vmatpush.msrb.mxu3 %v912_v7  ;;  %331 = vmatpush.msrb.mxu1 %v914_v9 }
  0x15   :  { %69 = vmatpush.msra.mxu0 %v54_v12  ;;  %407 = vmatpush.msrb.mxu2 %v914_v9 }
  0x16   :  { %476 = vmatpush.msrb.mxu3 %v914_v9  ;;  %332 = vmatpush.msrb.mxu1 %v924_v21 }
  0x17   :  { %70 = vmatpush.msra.mxu0 %v53_v13  ;;  %408 = vmatpush.msrb.mxu2 %v924_v21 }
  0x18   :  { %477 = vmatpush.msrb.mxu3 %v924_v21  ;;  %549 = vmatpush.msra.mxu1 %v909_v6 }
  0x19   :  { %71 = vmatpush.msra.mxu0 %v52_v14 }
  0x1a   :  { %550 = vmatpush.msra.mxu1 %v912_v7 }
  0x1b   :  { %72 = vmatpush.msra.mxu0 %v51_v15 }
  0x1c   :  { %551 = vmatpush.msra.mxu1 %v914_v9 }
  0x1d   :  { %73 = vmatpush.msra.mxu0 %v50_v16 }
  0x1e   :  { %552 = vmatpush.msra.mxu1 %v924_v21 }
  0x1f   :  { %74 = vmatpush.msra.mxu0 %v49_v17 }
  0x21   :  { %75 = vmatpush.msra.mxu0 %v48_v18 }
  0x23   :  { %76 = vmatpush.msra.mxu0 %v47_v19 }
  0x25   :  { %77 = vmatpush.msra.mxu0 %v46_v20 }
  0x79   :  { %v33_v25 = vpop.permute.xlu0 %32 }
  0x7a   :  { %vm37_vm1 = vcmp.eq.s32.totalorder %v945_v24, %v33_v25 }
  0x7b   :  { %vm40_vm2 = vmor %vm37_vm1, %vm39_vm0 }
  0x7c   :  { %766 = vmatmul.msk.f32.vlgmr.msra.gmra.mxu0 %vm40_vm2, %v885_v26 }
  0x8c   :  { %v115_v27 = vpop.f32.mrf.mxu1 }
  0xf9   :  { %v952_v28 = vpop.f32.mrf.mxu0 }
  0xfa   :  { %v118_v29 = vadd.f32 %v115_v27, %v952_v28 }
  0xfc   :  { %v768_v30 = vmul.f32 -1.442695, %v118_v29 }
  0xfe   :  { %798 = vpow2.f32 %v768_v30 }
 0x104   :  { %v799_v31 = vpop.eup %798 }
 0x105   :  { %v122_v32 = vadd.f32 1.0, %v799_v31 }
 0x107   :  { %800 = vrcp.f32 %v122_v32  ;;  %v134_v36 = vand.u32 2147483648, %v122_v32  ;;  %v132_v38 = vand.u32 2147483647, %v122_v32  ;;  %vm128_vm7 = vweird.f32 %v122_v32 }
 0x109   :  { %v135_v41 = vor.u32 1.1754944e-38, %v134_v36  ;;  %vm133_vm9 = vcmp.eq.f32.partialorder %v132_v38, 8.507059e+37 }
 0x10d   :  { %v801_v33 = vpop.eup %800 }
 0x10e   :  { %v124_v34 = vmul.f32 %v801_v33, %v122_v32  ;;  %vm129_vm6 = vweird.f32 %v801_v33 }
 0x10f   :  { %vm130_vm8 = vmor %vm128_vm7, %vm129_vm6 }
 0x110   :  { %v125_v35 = vsub.f32 1.0, %v124_v34 }
 0x112   :  { %v126_v37 = vmul.f32 %v801_v33, %v125_v35 }
 0x114   :  { %v127_v39 = vadd.f32 %v801_v33, %v126_v37 }
 0x116   :  { %v131_v42 = vsel %vm130_vm8, %v801_v33, %v127_v39 }
 0x117   :  { %v136_v44 = vsel %vm133_vm9, %v135_v41, %v131_v42 }
 0x118   :  { %v138_v45 = vmul.f32 %v136_v44, %v958_v40 }
 0x11a   :  { %v139_v46 = vadd.f32 %v138_v45, %v960_v43 }
 0x11c   :  { %142 = vrot.lane.b32.xlu0 %v139_v46, %s886_s1  ;;  %v140_v49 = vmul.f32 0.0, %v139_v46 }
 0x18e   :  { %v143_v47 = vpop.permute.xlu0 %142 }
 0x18f   :  { %v145_v48 = vmul.f32 %v143_v47, %v139_v46 }
 0x191   :  { %147 = vrot.lane.b32.xlu1 %v145_v48, %s887_s18 }
 0x203   :  { %v148_v50 = vpop.permute.xlu1 %147 }
 0x204   :  { %v150_v51 = vadd.f32 %v148_v50, %v140_v49 }
 0x206   :  { %802 = vtanh.f32 %v150_v51  ;;  %v211_v12 = vrot.slane %v150_v51, 6 }
 0x20c   :  { %v803_v52 = vpop.eup %802 }
 0x20d   :  { %153 = vrot.lane.b32.xlu1 %v803_v52, %s886_s1 }
 0x27f   :  { %v154_v53 = vpop.permute.xlu1 %153 }
 0x280   :  { %v156_v54 = vmul.f32 %v154_v53, %v139_v46 }
 0x282   :  { %158 = vrot.lane.b32.xlu2 %v156_v54, %s887_s18 }
 0x2dc   :  { %v159_v55 = vpop.permute.xlu2 %158 }
 0x2dd   :  { %162 = vst.msk [vmem:[#allocation2] sm:$0x3] %vm161_vm10, %v159_v55  ;;  %769 = vmatmul.msk.f32.vlgmr.msra.gmra.mxu2 %vm94_vm11, %v159_v55 }
 0x2de   :  { %624 = vmatpush.msra.mxu2 %v909_v6 }
 0x2e0   :  { %625 = vmatpush.msra.mxu2 %v912_v7 }
 0x2e2   :  { %626 = vmatpush.msra.mxu2 %v914_v9 }
 0x2e4   :  { %627 = vmatpush.msra.mxu2 %v924_v21 }
 0x360   :  { %v182_v56 = vpop.f32.mrf.mxu2 }
 0x361   :  { %v186_v57 = vrot.slane %v182_v56, 6 }
 0x363   :  { %v188_v58 = vadd.f32 %v186_v57, %v952_v28 }
 0x365   :  { %v770_v59 = vmul.f32 -1.442695, %v188_v58 }
 0x367   :  { %804 = vpow2.f32 %v770_v59 }
 0x36d   :  { %v805_v60 = vpop.eup %804 }
 0x36e   :  { %v192_v61 = vadd.f32 1.0, %v805_v60 }
 0x370   :  { %806 = vrcp.f32 %v192_v61  ;;  %v204_v1 = vand.u32 2147483648, %v192_v61  ;;  %v202_v3 = vand.u32 2147483647, %v192_v61  ;;  %vm198_vm13 = vweird.f32 %v192_v61 }
 0x372   :  { %v205_v5 = vor.u32 1.1754944e-38, %v204_v1  ;;  %vm203_vm15 = vcmp.eq.f32.partialorder %v202_v3, 8.507059e+37 }
 0x376   :  { %v807_v62 = vpop.eup %806 }
 0x377   :  { %v194_v63 = vmul.f32 %v807_v62, %v192_v61  ;;  %vm199_vm12 = vweird.f32 %v807_v62 }
 0x378   :  { %vm200_vm14 = vmor %vm198_vm13, %vm199_vm12 }
 0x379   :  { %v195_v0 = vsub.f32 1.0, %v194_v63 }
 0x37b   :  { %v196_v2 = vmul.f32 %v807_v62, %v195_v0 }
 0x37d   :  { %v197_v4 = vadd.f32 %v807_v62, %v196_v2 }
 0x37f   :  { %v201_v6 = vsel %vm200_vm14, %v807_v62, %v197_v4 }
 0x380   :  { %v206_v7 = vsel %vm203_vm15, %v205_v5, %v201_v6 }
 0x381   :  { %v208_v8 = vmul.f32 %v206_v7, %v958_v40 }
 0x383   :  { %v209_v9 = vadd.f32 %v208_v8, %v960_v43 }
 0x385   :  { %215 = vrot.lane.b32.xlu2 %v209_v9, %s886_s1  ;;  %v213_v13 = vmul.f32 %v211_v12, %v209_v9 }
 0x3df   :  { %v216_v10 = vpop.permute.xlu2 %215 }
 0x3e0   :  { %v218_v11 = vmul.f32 %v216_v10, %v209_v9 }
 0x3e2   :  { %220 = vrot.lane.b32.xlu0 %v218_v11, %s887_s18 }
 0x454   :  { %v221_v14 = vpop.permute.xlu0 %220 }
 0x455   :  { %v223_v15 = vadd.f32 %v221_v14, %v213_v13 }
 0x457   :  { %808 = vtanh.f32 %v223_v15  ;;  %v287_v46 = vrot.slane %v223_v15, 6  ;;  %v30_v15 = vld [vmem:[%s1068_s0 + $0x8] sm:$0xff] }
 0x45d   :  { %v809_v16 = vpop.eup %808 }
 0x45e   :  { %226 = vrot.lane.b32.xlu1 %v809_v16, %s886_s1 }
 0x4d0   :  { %v227_v17 = vpop.permute.xlu1 %226 }
 0x4d1   :  { %v980_v18 = vmul.f32 %v227_v17, %v209_v9 }
 0x4d3   :  { %v236_v19 = vrot.slane %v980_v18, 2 }
 0x4d5   :  { %237 = vrot.lane.b32.xlu2 %v236_v19, %s887_s18 }
 0x52f   :  { %v238_v20 = vpop.permute.xlu2 %237 }
 0x530   :  { %771 = vmatmul.msk.f32.vlgmr.msra.gmra.mxu3 %vm94_vm11, %v238_v20 }
 0x5b3   :  { %v258_v21 = vpop.f32.mrf.mxu3 }
 0x5b4   :  { %v262_v22 = vrot.slane %v258_v21, 4 }
 0x5b6   :  { %v264_v23 = vadd.f32 %v262_v22, %v952_v28 }
 0x5b8   :  { %v772_v25 = vmul.f32 -1.442695, %v264_v23 }
 0x5ba   :  { %810 = vpow2.f32 %v772_v25 }
 0x5c0   :  { %v811_v27 = vpop.eup %810 }
 0x5c1   :  { %v268_v29 = vadd.f32 1.0, %v811_v27 }
 0x5c3   :  { %812 = vrcp.f32 %v268_v29  ;;  %v280_v33 = vand.u32 2147483648, %v268_v29  ;;  %v278_v35 = vand.u32 2147483647, %v268_v29  ;;  %vm274_vm2 = vweird.f32 %v268_v29 }
 0x5c5   :  { %v281_v37 = vor.u32 1.1754944e-38, %v280_v33  ;;  %vm279_vm4 = vcmp.eq.f32.partialorder %v278_v35, 8.507059e+37 }
 0x5c9   :  { %v813_v30 = vpop.eup %812 }
 0x5ca   :  { %v270_v31 = vmul.f32 %v813_v30, %v268_v29  ;;  %vm275_vm1 = vweird.f32 %v813_v30 }
 0x5cb   :  { %vm276_vm3 = vmor %vm274_vm2, %vm275_vm1 }
 0x5cc   :  { %v271_v32 = vsub.f32 1.0, %v270_v31 }
 0x5ce   :  { %v272_v34 = vmul.f32 %v813_v30, %v271_v32 }
 0x5d0   :  { %v273_v36 = vadd.f32 %v813_v30, %v272_v34 }
 0x5d2   :  { %v277_v38 = vsel %vm276_vm3, %v813_v30, %v273_v36 }
 0x5d3   :  { %v282_v39 = vsel %vm279_vm4, %v281_v37, %v277_v38 }
 0x5d4   :  { %v284_v41 = vmul.f32 %v282_v39, %v958_v40 }
 0x5d6   :  { %v285_v42 = vadd.f32 %v284_v41, %v960_v43 }
 0x5d8   :  { %291 = vrot.lane.b32.xlu0 %v285_v42, %s886_s1  ;;  %v289_v47 = vmul.f32 %v287_v46, %v285_v42 }
 0x64a   :  { %v292_v44 = vpop.permute.xlu0 %291 }
 0x64b   :  { %v294_v45 = vmul.f32 %v292_v44, %v285_v42 }
 0x64d   :  { %296 = vrot.lane.b32.xlu1 %v294_v45, %s887_s18 }
 0x6bf   :  { %v297_v48 = vpop.permute.xlu1 %296 }
 0x6c0   :  { %v299_v49 = vadd.f32 %v297_v48, %v289_v47 }
 0x6c2   :  { %814 = vtanh.f32 %v299_v49  ;;  %v363_v10 = vrot.slane %v299_v49, 6 }
 0x6c8   :  { %v815_v50 = vpop.eup %814 }
 0x6c9   :  { %302 = vrot.lane.b32.xlu2 %v815_v50, %s886_s1 }
 0x723   :  { %v303_v51 = vpop.permute.xlu2 %302 }
 0x724   :  { %v991_v52 = vmul.f32 %v303_v51, %v285_v42 }
 0x726   :  { %v312_v53 = vrot.slane %v991_v52, 4 }
 0x728   :  { %313 = vrot.lane.b32.xlu0 %v312_v53, %s887_s18 }
 0x79a   :  { %v314_v54 = vpop.permute.xlu0 %313 }
 0x79b   :  { %773 = vmatmul.msk.f32.vlgmr.msrb.gmra.mxu1 %vm94_vm11, %v314_v54 }
 0x818   :  { %v334_v55 = vpop.f32.mrf.mxu1 }
 0x819   :  { %v338_v56 = vrot.slane %v334_v55, 2 }
 0x81b   :  { %v340_v57 = vadd.f32 %v338_v56, %v952_v28 }
 0x81d   :  { %v774_v58 = vmul.f32 -1.442695, %v340_v57 }
 0x81f   :  { %816 = vpow2.f32 %v774_v58 }
 0x825   :  { %v817_v59 = vpop.eup %816 }
 0x826   :  { %v344_v60 = vadd.f32 1.0, %v817_v59 }
 0x828   :  { %818 = vrcp.f32 %v344_v60  ;;  %v356_v0 = vand.u32 2147483648, %v344_v60  ;;  %v354_v2 = vand.u32 2147483647, %v344_v60  ;;  %vm350_vm6 = vweird.f32 %v344_v60 }
 0x82a   :  { %v357_v4 = vor.u32 1.1754944e-38, %v356_v0  ;;  %vm355_vm8 = vcmp.eq.f32.partialorder %v354_v2, 8.507059e+37 }
 0x82e   :  { %v819_v61 = vpop.eup %818 }
 0x82f   :  { %v346_v62 = vmul.f32 %v819_v61, %v344_v60  ;;  %vm351_vm5 = vweird.f32 %v819_v61 }
 0x830   :  { %vm352_vm7 = vmor %vm350_vm6, %vm351_vm5 }
 0x831   :  { %v347_v63 = vsub.f32 1.0, %v346_v62 }
 0x833   :  { %v348_v1 = vmul.f32 %v819_v61, %v347_v63 }
 0x835   :  { %v349_v3 = vadd.f32 %v819_v61, %v348_v1 }
 0x837   :  { %v353_v5 = vsel %vm352_vm7, %v819_v61, %v349_v3 }
 0x838   :  { %v358_v6 = vsel %vm355_vm8, %v357_v4, %v353_v5 }
 0x839   :  { %v360_v28 = vmul.f32 %v358_v6, %v958_v40 }
 0x83b   :  { %v361_v7 = vadd.f32 %v360_v28, %v960_v43 }
 0x83d   :  { %367 = vrot.lane.b32.xlu1 %v361_v7, %s886_s1  ;;  %v365_v11 = vmul.f32 %v363_v10, %v361_v7 }
 0x8af   :  { %v368_v8 = vpop.permute.xlu1 %367 }
 0x8b0   :  { %v370_v9 = vmul.f32 %v368_v8, %v361_v7 }
 0x8b2   :  { %372 = vrot.lane.b32.xlu2 %v370_v9, %s887_s18 }
 0x8ba   :  { %35 = vperm.xlu2 %796, %v30_v15  }
 0x90c   :  { %v373_v12 = vpop.permute.xlu2 %372 }
 0x90d   :  { %v375_v13 = vadd.f32 %v373_v12, %v365_v11 }
 0x90f   :  { %820 = vtanh.f32 %v375_v13  ;;  %v436_v45 = vrot.slane %v375_v13, 6 }
 0x914   :  { %v36_v20 = vpop.permute.xlu2 %35 }
 0x915   :  { %v821_v14 = vpop.eup %820  ;;  %vm38_vm9 = vcmp.eq.s32.totalorder %v945_v24, %v36_v20 }
 0x916   :  { %378 = vrot.lane.b32.xlu0 %v821_v14, %s886_s1  ;;  %vm41_vm12 = vmor %vm38_vm9, %vm39_vm0 }
 0x917   :  { %767 = vmatmul.msk.f32.gmra.mxu0 %vm41_vm12, %v885_v26 }
 0x988   :  { %v379_v16 = vpop.permute.xlu0 %378 }
 0x989   :  { %v1005_v17 = vmul.f32 %v379_v16, %v361_v7 }
 0x98b   :  { %v388_v19 = vrot.slane %v1005_v17, 6 }
 0x98d   :  { %389 = vrot.lane.b32.xlu1 %v388_v19, %s887_s18 }
 0x994   :  { %v1014_v22 = vpop.f32.mrf.mxu0 }
 0x9ff   :  { %v390_v21 = vpop.permute.xlu1 %389 }
 0xa00   :  { %775 = vmatmul.msk.f32.vlgmr.msrb.gmra.mxu2 %vm94_vm11, %v390_v21 }
 0xa83   :  { %v410_v23 = vpop.f32.mrf.mxu2 }
 0xa84   :  { %v413_v25 = vadd.f32 %v410_v23, %v1014_v22 }
 0xa86   :  { %v776_v27 = vmul.f32 -1.442695, %v413_v25 }
 0xa88   :  { %822 = vpow2.f32 %v776_v27 }
 0xa8e   :  { %v823_v29 = vpop.eup %822 }
 0xa8f   :  { %v417_v30 = vadd.f32 1.0, %v823_v29 }
 0xa91   :  { %824 = vrcp.f32 %v417_v30  ;;  %v429_v24 = vand.u32 2147483648, %v417_v30  ;;  %v427_v26 = vand.u32 2147483647, %v417_v30  ;;  %vm423_vm13 = vweird.f32 %v417_v30 }
 0xa93   :  { %v430_v36 = vor.u32 1.1754944e-38, %v429_v24  ;;  %vm428_vm15 = vcmp.eq.f32.partialorder %v427_v26, 8.507059e+37 }
 0xa97   :  { %v825_v31 = vpop.eup %824 }
 0xa98   :  { %v419_v32 = vmul.f32 %v825_v31, %v417_v30  ;;  %vm424_vm0 = vweird.f32 %v825_v31 }
 0xa99   :  { %vm425_vm14 = vmor %vm423_vm13, %vm424_vm0  ;;  %vm234_vm13 = vcmask 257026  }
 0xa9a   :  { %v420_v33 = vsub.f32 1.0, %v419_v32 }
 0xa9c   :  { %v421_v34 = vmul.f32 %v825_v31, %v420_v33 }
 0xa9e   :  { %v422_v35 = vadd.f32 %v825_v31, %v421_v34 }
 0xaa0   :  { %v426_v37 = vsel %vm425_vm14, %v825_v31, %v422_v35  ;;  %vm310_vm14 = vcmask 259076  }
 0xaa1   :  { %v431_v38 = vsel %vm428_vm15, %v430_v36, %v426_v37  ;;  %vm386_vm15 = vcmask 261126  }
 0xaa2   :  { %v433_v39 = vmul.f32 %v431_v38, %v958_v40 }
 0xaa4   :  { %v434_v41 = vadd.f32 %v433_v39, %v960_v43 }
 0xaa6   :  { %440 = vrot.lane.b32.xlu0 %v434_v41, %s886_s1  ;;  %v438_v46 = vmul.f32 %v436_v45, %v434_v41 }
 0xb18   :  { %v441_v42 = vpop.permute.xlu0 %440 }
 0xb19   :  { %v443_v44 = vmul.f32 %v441_v42, %v434_v41 }
 0xb1b   :  { %445 = vrot.lane.b32.xlu1 %v443_v44, %s887_s18 }
 0xb8d   :  { %v446_v47 = vpop.permute.xlu1 %445 }
 0xb8e   :  { %v448_v48 = vadd.f32 %v446_v47, %v438_v46 }
 0xb90   :  { %826 = vtanh.f32 %v448_v48  ;;  %v508_v9 = vrot.slane %v448_v48, 6 }
 0xb96   :  { %v827_v49 = vpop.eup %826 }
 0xb97   :  { %451 = vrot.lane.b32.xlu2 %v827_v49, %s886_s1 }
 0xbf1   :  { %v452_v50 = vpop.permute.xlu2 %451 }
 0xbf2   :  { %v454_v51 = vmul.f32 %v452_v50, %v434_v41 }
 0xbf4   :  { %456 = vrot.lane.b32.xlu0 %v454_v51, %s887_s18 }
 0xc66   :  { %v457_v53 = vpop.permute.xlu0 %456 }
 0xc67   :  { %459 = vst.msk [vmem:[#allocation2 + $0x8] sm:$0x3] %vm161_vm10, %v457_v53  ;;  %777 = vmatmul.msk.f32.vlgmr.msrb.gmra.mxu3 %vm94_vm11, %v457_v53 }
 0xcea   :  { %v479_v54 = vpop.f32.mrf.mxu3 }
 0xceb   :  { %v483_v55 = vrot.slane %v479_v54, 6 }
 0xced   :  { %v485_v56 = vadd.f32 %v483_v55, %v1014_v22 }
 0xcef   :  { %v778_v57 = vmul.f32 -1.442695, %v485_v56 }
 0xcf1   :  { %828 = vpow2.f32 %v778_v57 }
 0xcf7   :  { %v829_v58 = vpop.eup %828 }
 0xcf8   :  { %v489_v59 = vadd.f32 1.0, %v829_v58 }
 0xcfa   :  { %830 = vrcp.f32 %v489_v59  ;;  %v501_v63 = vand.u32 2147483648, %v489_v59  ;;  %v499_v1 = vand.u32 2147483647, %v489_v59  ;;  %vm495_vm10 = vweird.f32 %v489_v59 }
 0xcfc   :  { %v502_v3 = vor.u32 1.1754944e-38, %v501_v63  ;;  %vm500_vm3 = vcmp.eq.f32.partialorder %v499_v1, 8.507059e+37 }
 0xd00   :  { %v831_v60 = vpop.eup %830 }
 0xd01   :  { %v491_v61 = vmul.f32 %v831_v60, %v489_v59  ;;  %vm496_vm1 = vweird.f32 %v831_v60 }
 0xd02   :  { %vm497_vm2 = vmor %vm495_vm10, %vm496_vm1 }
 0xd03   :  { %v492_v62 = vsub.f32 1.0, %v491_v61 }
 0xd05   :  { %v493_v0 = vmul.f32 %v831_v60, %v492_v62 }
 0xd07   :  { %v494_v2 = vadd.f32 %v831_v60, %v493_v0 }
 0xd09   :  { %v498_v4 = vsel %vm497_vm2, %v831_v60, %v494_v2 }
 0xd0a   :  { %v503_v5 = vsel %vm500_vm3, %v502_v3, %v498_v4 }
 0xd0b   :  { %v505_v6 = vmul.f32 %v503_v5, %v958_v40 }
 0xd0d   :  { %v506_v28 = vadd.f32 %v505_v6, %v960_v43 }
 0xd0f   :  { %512 = vrot.lane.b32.xlu1 %v506_v28, %s886_s1  ;;  %v510_v10 = vmul.f32 %v508_v9, %v506_v28 }
 0xd81   :  { %v513_v7 = vpop.permute.xlu1 %512 }
 0xd82   :  { %v515_v8 = vmul.f32 %v513_v7, %v506_v28 }
 0xd84   :  { %517 = vrot.lane.b32.xlu2 %v515_v8, %s887_s18 }
 0xdde   :  { %v518_v11 = vpop.permute.xlu2 %517 }
 0xddf   :  { %v520_v12 = vadd.f32 %v518_v11, %v510_v10 }
 0xde1   :  { %832 = vtanh.f32 %v520_v12  ;;  %v583_v44 = vrot.slane %v520_v12, 6 }
 0xde7   :  { %v833_v13 = vpop.eup %832 }
 0xde8   :  { %523 = vrot.lane.b32.xlu0 %v833_v13, %s886_s1 }
 0xe5a   :  { %v524_v14 = vpop.permute.xlu0 %523 }
 0xe5b   :  { %v1031_v15 = vmul.f32 %v524_v14, %v506_v28  ;;  %v684_v14 = vld [vmem:[#allocation3 + $0xb0] sm:$0xff] }
 0xe5d   :  { %v532_v16 = vrot.slane %v1031_v15, 2 }
 0xe5f   :  { %533 = vrot.lane.b32.xlu1 %v532_v16, %s887_s18  ;;  %v682_v16 = vld [vmem:[#allocation3 + $0xa0] sm:$0xff] }
 0xed1   :  { %v534_v19 = vpop.permute.xlu1 %533 }
 0xed2   :  { %779 = vmatmul.msk.f32.vlgmr.msra.gmra.mxu1 %vm94_vm11, %v534_v19 }
 0xf4f   :  { %v554_v20 = vpop.f32.mrf.mxu1 }
 0xf50   :  { %v558_v21 = vrot.slane %v554_v20, 4 }
 0xf52   :  { %v560_v23 = vadd.f32 %v558_v21, %v1014_v22 }
 0xf54   :  { %v780_v25 = vmul.f32 -1.442695, %v560_v23 }
 0xf56   :  { %834 = vpow2.f32 %v780_v25 }
 0xf5c   :  { %v835_v27 = vpop.eup %834 }
 0xf5d   :  { %v564_v29 = vadd.f32 1.0, %v835_v27  ;;  %v797_v27 = vld [vmem:[#allocation3 + $0xc0] ss:$0 sm:$0xff] }
 0xf5f   :  { %836 = vrcp.f32 %v564_v29  ;;  %v576_v33 = vand.u32 2147483648, %v564_v29  ;;  %v574_v34 = vand.u32 2147483647, %v564_v29  ;;  %vm570_vm5 = vweird.f32 %v564_v29 }
 0xf61   :  { %v577_v35 = vor.u32 1.1754944e-38, %v576_v33  ;;  %vm575_vm7 = vcmp.eq.f32.partialorder %v574_v34, 8.507059e+37 }
 0xf65   :  { %v837_v30 = vpop.eup %836 }
 0xf66   :  { %v566_v31 = vmul.f32 %v837_v30, %v564_v29  ;;  %vm571_vm4 = vweird.f32 %v837_v30 }
 0xf67   :  { %vm572_vm6 = vmor %vm570_vm5, %vm571_vm4 }
 0xf68   :  { %v567_v32 = vsub.f32 1.0, %v566_v31 }
 0xf6a   :  { %v568_v24 = vmul.f32 %v837_v30, %v567_v32 }
 0xf6c   :  { %v569_v26 = vadd.f32 %v837_v30, %v568_v24 }
 0xf6e   :  { %v573_v36 = vsel %vm572_vm6, %v837_v30, %v569_v26 }
 0xf6f   :  { %v578_v37 = vsel %vm575_vm7, %v577_v35, %v573_v36 }
 0xf70   :  { %v580_v38 = vmul.f32 %v578_v37, %v958_v40 }
 0xf72   :  { %v581_v39 = vadd.f32 %v580_v38, %v960_v43 }
 0xf74   :  { %587 = vrot.lane.b32.xlu2 %v581_v39, %s886_s1  ;;  %v585_v45 = vmul.f32 %v583_v44, %v581_v39 }
 0xfce   :  { %v588_v41 = vpop.permute.xlu2 %587 }
 0xfcf   :  { %v590_v42 = vmul.f32 %v588_v41, %v581_v39 }
 0xfd1   :  { %592 = vrot.lane.b32.xlu0 %v590_v42, %s887_s18 }
0x1043   :  { %v593_v46 = vpop.permute.xlu0 %592 }
0x1044   :  { %v595_v47 = vadd.f32 %v593_v46, %v585_v45 }
0x1046   :  { %838 = vtanh.f32 %v595_v47 }
0x104c   :  { %v839_v48 = vpop.eup %838 }
0x104d   :  { %598 = vrot.lane.b32.xlu1 %v839_v48, %s886_s1 }
0x10bf   :  { %v599_v49 = vpop.permute.xlu1 %598 }
0x10c0   :  { %v601_v50 = vmul.f32 %v599_v49, %v581_v39 }
0x10c2   :  { %v607_v51 = vrot.slane %v601_v50, 4 }
0x10c4   :  { %608 = vrot.lane.b32.xlu2 %v607_v51, %s887_s18 }
0x111e   :  { %v609_v53 = vpop.permute.xlu2 %608 }
0x111f   :  { %781 = vmatmul.msk.f32.vlgmr.msra.gmra.mxu2 %vm94_vm11, %v609_v53 }
0x11a2   :  { %v629_v54 = vpop.f32.mrf.mxu2 }
0x11a3   :  { %v633_v55 = vrot.slane %v629_v54, 2 }
0x11a5   :  { %v635_v56 = vadd.f32 %v633_v55, %v1014_v22 }
0x11a7   :  { %v782_v57 = vmul.f32 -1.442695, %v635_v56 }
0x11a9   :  { %840 = vpow2.f32 %v782_v57 }
0x11af   :  { %v841_v58 = vpop.eup %840 }
0x11b0   :  { %v639_v59 = vadd.f32 1.0, %v841_v58 }
0x11b2   :  { %842 = vrcp.f32 %v639_v59  ;;  %v651_v63 = vand.u32 2147483648, %v639_v59  ;;  %v649_v1 = vand.u32 2147483647, %v639_v59  ;;  %vm645_vm9 = vweird.f32 %v639_v59 }
0x11b4   :  { %v652_v3 = vor.u32 1.1754944e-38, %v651_v63  ;;  %vm650_vm0 = vcmp.eq.f32.partialorder %v649_v1, 8.507059e+37 }
0x11b8   :  { %v843_v60 = vpop.eup %842 }
0x11b9   :  { %v641_v61 = vmul.f32 %v843_v60, %v639_v59  ;;  %vm646_vm8 = vweird.f32 %v843_v60 }
0x11ba   :  { %vm647_vm12 = vmor %vm645_vm9, %vm646_vm8 }
0x11bb   :  { %v642_v62 = vsub.f32 1.0, %v641_v61 }
0x11bd   :  { %v643_v0 = vmul.f32 %v843_v60, %v642_v62 }
0x11bf   :  { %v644_v2 = vadd.f32 %v843_v60, %v643_v0 }
0x11c1   :  { %v648_v4 = vsel %vm647_vm12, %v843_v60, %v644_v2 }
0x11c2   :  { %v653_v5 = vsel %vm650_vm0, %v652_v3, %v648_v4 }
0x11c3   :  { %v655_v22 = vmul.f32 %v653_v5, %v958_v40 }
0x11c5   :  { %v656_v6 = vadd.f32 %v655_v22, %v960_v43  ;;  %v658_v43 = vrot.slane %v595_v47, 6 }
0x11c7   :  { %662 = vrot.lane.b32.xlu0 %v656_v6, %s886_s1  ;;  %v660_v9 = vmul.f32 %v658_v43, %v656_v6 }
0x11cf   :  { %231 = vrot.lane.b32.xlu0 %v980_v18, %s887_s18 }
0x11d7   :  { %528 = vrot.lane.b32.xlu0 %v1031_v15, %s887_s18  ;;  %v683_v15 = vld [vmem:[#allocation3 + $0xa8] sm:$0xff] }
0x1239   :  { %v663_v28 = vpop.permute.xlu0 %662 }
0x123a   :  { %v665_v7 = vmul.f32 %v663_v28, %v656_v6 }
0x123c   :  { %667 = vrot.lane.b32.xlu1 %v665_v7, %s887_s18 }
0x1241   :  { %v232_v8 = vpop.permute.xlu0 %231 }
0x1242   :  { %235 = vst.msk [vmem:[#allocation2] sm:$0xc] %vm234_vm13, %v232_v8 }
0x1244   :  { %307 = vrot.lane.b32.xlu1 %v991_v52, %s887_s18  ;;  %v685_v52 = vld [vmem:[#allocation3 + $0xb8] sm:$0xff] }
0x1245   :  { %708 = vmatpush.msra.mxu3 %v685_v52 }
0x1247   :  { %709 = vmatpush.msra.mxu3 %v684_v14 }
0x1249   :  { %v529_v40 = vpop.permute.xlu0 %528  ;;  %710 = vmatpush.msra.mxu3 %v683_v15 }
0x124a   :  { %531 = vst.msk [vmem:[#allocation2 + $0x8] sm:$0xc] %vm234_vm13, %v529_v40 }
0x124b   :  { %711 = vmatpush.msra.mxu3 %v682_v16 }
0x124c   :  { %603 = vrot.lane.b32.xlu1 %v601_v50, %s887_s18 }
0x12ae   :  { %v668_v18 = vpop.permute.xlu1 %667 }
0x12af   :  { %v670_v10 = vadd.f32 %v668_v18, %v660_v9 }
0x12b1   :  { %844 = vtanh.f32 %v670_v10 }
0x12b6   :  { %v308_v11 = vpop.permute.xlu1 %307 }
0x12b7   :  { %v845_v12 = vpop.eup %844  ;;  %311 = vst.msk [vmem:[#allocation2] sm:$0x30] %vm310_vm14, %v308_v11 }
0x12b8   :  { %673 = vrot.lane.b32.xlu2 %v845_v12, %s886_s1 }
0x12be   :  { %v604_v13 = vpop.permute.xlu1 %603 }
0x12bf   :  { %606 = vst.msk [vmem:[#allocation2 + $0x8] sm:$0x30] %vm310_vm14, %v604_v13 }
0x12c0   :  { %383 = vrot.lane.b32.xlu2 %v1005_v17, %s887_s18 }
0x1312   :  { %v674_v19 = vpop.permute.xlu2 %673 }
0x1313   :  { %v676_v20 = vmul.f32 %v674_v19, %v656_v6 }
0x1315   :  { %678 = vrot.lane.b32.xlu2 %v676_v20, %s887_s18 }
0x131a   :  { %v384_v21 = vpop.permute.xlu2 %383 }
0x131b   :  { %387 = vst.msk [vmem:[#allocation2] sm:$0xc0] %vm386_vm15, %v384_v21 }
0x1322   :  { %v687_v23 = vld [vmem:[#allocation2] sm:$0xff] }
0x1323   :  { %783 = vmatmul.msk.f32.vlgmr.msra.gmra.mxu3 %vm94_vm11, %v687_v23 }
0x136f   :  { %v679_v25 = vpop.permute.xlu2 %678 }
0x1370   :  { %681 = vst.msk [vmem:[#allocation2 + $0x8] sm:$0xc0] %vm386_vm15, %v679_v25 }
0x1377   :  { %v688_v17 = vld [vmem:[#allocation2 + $0x8] sm:$0xff] }
0x1378   :  { %784 = vmatmul.msk.f32.gmra.mxu3 %vm94_vm11, %v688_v17 }
0x13a6   :  { %v713_v29 = vpop.f32.mrf.mxu3 }
0x13a7   :  { %v714_v30 = vadd.f32 %v797_v27, %v713_v29 }
0x13a9   :  { %v785_v31 = vmul.f32 -1.442695, %v714_v30 }
0x13ab   :  { %846 = vpow2.f32 %v785_v31 }
0x13b1   :  { %v847_v32 = vpop.eup %846 }
0x13b2   :  { %v725_v33 = vadd.f32 1.0, %v847_v32 }
0x13b4   :  { %848 = vrcp.f32 %v725_v33  ;;  %v738_v35 = vand.u32 2147483648, %v725_v33  ;;  %v736_v37 = vand.u32 2147483647, %v725_v33  ;;  %vm732_vm10 = vweird.f32 %v725_v33 }
0x13b6   :  { %v739_v39 = vor.u32 1.1754944e-38, %v738_v35  ;;  %vm737_vm11 = vcmp.eq.f32.partialorder %v736_v37, 8.507059e+37 }
0x13ba   :  { %v849_v24 = vpop.eup %848 }
0x13bb   :  { %v728_v34 = vmul.f32 %v849_v24, %v725_v33  ;;  %vm733_vm1 = vweird.f32 %v849_v24 }
0x13bc   :  { %vm734_vm2 = vmor %vm732_vm10, %vm733_vm1 }
0x13bd   :  { %v729_v26 = vsub.f32 1.0, %v728_v34 }
0x13bf   :  { %v730_v36 = vmul.f32 %v849_v24, %v729_v26 }
0x13c1   :  { %v731_v38 = vadd.f32 %v849_v24, %v730_v36 }
0x13c3   :  { %v735_v41 = vsel %vm734_vm2, %v849_v24, %v731_v38 }
0x13c4   :  { %v740_v42 = vsel %vm737_vm11, %v739_v39, %v735_v41 }
0x13c5   :  { %757 = vst [vmem:[%s1070_s2] sm:$0xff] %v740_v42 }
0x13fb   :  { %v716_v44 = vpop.f32.mrf.mxu3 }
0x13fc   :  { %v717_v45 = vadd.f32 %v797_v27, %v716_v44 }
0x13fe   :  { %v786_v46 = vmul.f32 -1.442695, %v717_v45 }
0x1400   :  { %850 = vpow2.f32 %v786_v46 }
0x1406   :  { %v851_v47 = vpop.eup %850 }
0x1407   :  { %v726_v48 = vadd.f32 1.0, %v851_v47 }
0x1409   :  { %852 = vrcp.f32 %v726_v48  ;;  %v753_v53 = vand.u32 2147483648, %v726_v48  ;;  %v751_v55 = vand.u32 2147483647, %v726_v48  ;;  %vm747_vm4 = vweird.f32 %v726_v48 }
0x140b   :  { %v754_v57 = vor.u32 1.1754944e-38, %v753_v53  ;;  %vm752_vm6 = vcmp.eq.f32.partialorder %v751_v55, 8.507059e+37 }
0x140f   :  { %v853_v49 = vpop.eup %852 }
0x1410   :  { %v743_v50 = vmul.f32 %v853_v49, %v726_v48  ;;  %vm748_vm3 = vweird.f32 %v853_v49 }
0x1411   :  { %vm749_vm5 = vmor %vm747_vm4, %vm748_vm3 }
0x1412   :  { %v744_v51 = vsub.f32 1.0, %v743_v50 }
0x1414   :  { %v745_v54 = vmul.f32 %v853_v49, %v744_v51 }
0x1416   :  { %v746_v56 = vadd.f32 %v853_v49, %v745_v54 }
0x1418   :  { %v750_v58 = vsel %vm749_vm5, %v853_v49, %v746_v56 }
0x1419   :  { %v755_v59 = vsel %vm752_vm6, %v754_v57, %v750_v58 }
0x141a   :  { %758 = vst [vmem:[%s1070_s2 + $0x8] sm:$0xff] %v755_v59 }
0x141b   :  { %763 = vsyncpa [#allocation4], 1 }

</bundles_post_ra>
